<compile_context>
chip_gen: v5e
topology: v5e:2x2
jax: 0.10.0
libtpu: 0.0.40
codegen_flags: <defaults>
</compile_context>

<pallas_src>
import jax
import jax.numpy as jnp
from jax.experimental import pallas as pl
from jax.experimental.pallas import tpu as pltpu


def _deepstream_kernel(x_ref, scores_ref, classes_ref):
    # x_ref block: (tile, C) anchor-major, straight from the (B*N, C) input.
    x = x_ref[...]
    c = x.shape[1]
    num_cls = c - 5

    # Relayout to channel-major on the XLU (idle in this kernel): anchors move
    # onto the 128-lane axis so the class max/argmax is a cheap sublane (axis-0)
    # reduce and both output stores are lane-dense.
    xt = jnp.transpose(x)                                    # (C, tile)

    obj = xt[4:5, :]                                         # (1, tile)

    # Class channels are rows 5..C-1.  Mask (broadcast from a (C, 1) iota)
    # instead of slicing so the big class block never needs an extra
    # sublane-offset relayout copy and no (C, tile) index plane is materialized.
    row = jax.lax.broadcasted_iota(jnp.int32, (c, 1), 0)     # (C, 1)
    is_cls = row >= 5                                        # (C, 1)
    neg_inf = jnp.asarray(-jnp.inf, dtype=xt.dtype)
    cls_vals = jnp.where(is_cls, xt, neg_inf)                # (C, tile)
    max_val = jnp.max(cls_vals, axis=0, keepdims=True)       # (1, tile) sublane reduce

    # argmax with PyTorch's first-maximal-index tie-break: smallest class index
    # among positions equal to the max.
    cand = jnp.where(is_cls & (cls_vals == max_val), row - 5, num_cls)
    arg = jnp.min(cand, axis=0, keepdims=True)               # (1, tile) int32
    # All-NaN class rows never match max_val; clamp so the index stays in range
    # (scores are NaN either way, matching PyTorch up to the arbitrary index).
    arg = jnp.minimum(arg, num_cls - 1)

    scores_ref[...] = (max_val * obj).astype(scores_ref.dtype)
    classes_ref[...] = arg.astype(classes_ref.dtype)


def _pick_tile(m, c, tile_n, min_steps):
    """Anchor tile: as big as possible (amortize ~0.35us/step overhead), capped
    at 8192, guarded by a rough VMEM-footprint estimate, and shrunk only as far
    as needed to keep >= min_steps grid steps (pipeline / megacore feed)."""
    lane_c = -(-c // 128) * 128
    sub_c = -(-c // 8) * 8

    def footprint(t):
        in_bufs = 2 * t * lane_c * 4          # double-buffered input block (lane-padded)
        temps = 4 * sub_c * t * 4             # xt / cls_vals / cand + slack
        outs = 2 * 2 * 8 * t * 4              # two (1, t) outputs, dbl-buffered, sublane-padded
        return in_bufs + temps + outs

    tile = max(128, min(int(tile_n), 8192))
    tile -= tile % 128
    while tile > 128 and footprint(tile) > 20 * 1024 * 1024:
        half = tile // 2
        tile = max(128, half - half % 128)
    while tile > 128 and pl.cdiv(m, tile) < min_steps:
        half = tile // 2
        tile = max(128, half - half % 128)
    return tile


def deepstream_scores_classes(x2d, *, tile_n=4096, min_steps=2):
    """Kernel launcher on the flattened (M, C) predictions (M = B*N anchors,
    C = 5 + num_classes).  Returns channel-major (1, M) scores (x dtype) and
    (1, M) classes (float32)."""
    m, c = x2d.shape
    assert c > 5, "need at least one class channel"

    tile = _pick_tile(m, c, tile_n, min_steps)
    grid = (pl.cdiv(m, tile),)

    out_shapes = (
        jax.ShapeDtypeStruct((1, m), x2d.dtype),     # scores
        jax.ShapeDtypeStruct((1, m), jnp.float32),   # classes (.float())
    )

    return pl.pallas_call(
        _deepstream_kernel,
        out_shape=out_shapes,
        grid=grid,
        in_specs=[pl.BlockSpec((tile, c), lambda i: (i, 0))],
        out_specs=[
            pl.BlockSpec((1, tile), lambda i: (0, i)),
            pl.BlockSpec((1, tile), lambda i: (0, i)),
        ],
        compiler_params=pltpu.CompilerParams(
            dimension_semantics=("parallel",),
            vmem_limit_bytes=32 * 1024 * 1024,
        ),
    )(x2d)


def deepstream_output(x, *, tile_n=4096, min_steps=2):
    """Matches the PyTorch module: x (B, N, C) -> (boxes, scores, classes)."""
    b, n, c = x.shape
    x2d = x.reshape(b * n, c)                        # free reshape, no data movement
    scores_cm, classes_cm = deepstream_scores_classes(
        x2d, tile_n=tile_n, min_steps=min_steps)
    boxes = x[:, :, :4]                              # identity slice; not routed through kernel
    scores = scores_cm.reshape(b, n, 1)              # (1, M) -> (B, N, 1): free reshape
    classes = classes_cm.reshape(b, n, 1)
    return boxes, scores, classes


def _reference(x):
    boxes = x[:, :, :4]
    objectness = x[:, :, 4:5]
    cls = x[:, :, 5:]
    scores = jnp.max(cls, axis=2, keepdims=True) * objectness
    classes = jnp.argmax(cls, axis=2, keepdims=True).astype(jnp.float32)
    return boxes, scores, classes


if __name__ == "__main__":
    key = jax.random.PRNGKey(0)

    # (B, N, num_classes): one tile-divisible case and one ragged-tail case.
    cases = [(2, 1024, 16), (1, 300, 3)]
    for b, n, ncls in cases:
        c = 5 + ncls
        key, sub = jax.random.split(key)
        x = jax.random.normal(sub, (b, n, c), dtype=jnp.float32)

        boxes, scores, classes = deepstream_output(x)
        jax.block_until_ready((boxes, scores, classes))

        ref_boxes, ref_scores, ref_classes = _reference(x)
        assert boxes.shape == (b, n, 4)
        assert scores.shape == (b, n, 1)
        assert classes.shape == (b, n, 1)
        assert jnp.array_equal(boxes, ref_boxes)
        assert jnp.allclose(scores, ref_scores, atol=1e-6)
        assert jnp.array_equal(classes, ref_classes)

    print("KERNEL_OK")
</pallas_src>

<mosaic_0001>
module attributes {stable_mosaic.version = 11 : i64} {
  func.func @_deepstream_kernel(%arg0: i32, %arg1: memref<1024x21xf32, #tpu.memory_space<vmem>>, %arg2: memref<1x1024xf32, #tpu.memory_space<vmem>>, %arg3: memref<1x1024xf32, #tpu.memory_space<vmem>>) attributes {dimension_semantics = [#tpu.dimension_semantics<parallel>], iteration_bounds = array<i64: 2>, scalar_prefetch = 0 : i64, scratch_operands = 0 : i64, tpu.core_type = #tpu.core_type<tc>, window_params = [{transform_indices = @transform_0, window_bounds = array<i64: 1024, 21>}, {transform_indices = @transform_1, window_bounds = array<i64: 1, 1024>}, {transform_indices = @transform_2, window_bounds = array<i64: 1, 1024>}]} {
    %c0 = arith.constant 0 : index
    %c0_0 = arith.constant 0 : index
    %0 = vector.load %arg1[%c0, %c0_0] : memref<1024x21xf32, #tpu.memory_space<vmem>>, vector<1024x21xf32>
    %1 = tpu.transpose %0, [1, 0] : vector<1024x21xf32> -> vector<21x1024xf32>
    %2 = vector.extract_strided_slice %1 {offsets = [4, 0], sizes = [1, 1024], strides = [1, 1]} : vector<21x1024xf32> to vector<1x1024xf32>
    %3 = tpu.iota {dimensions = array<i32: 0>} : vector<21x1xi32>
    %c5_i32 = arith.constant 5 : i32
    %4 = vector.broadcast %c5_i32 : i32 to vector<21x1xi32>
    %5 = arith.cmpi sge, %3, %4 : vector<21x1xi32>
    %cst = arith.constant 0xFF800000 : f32
    %6 = vector.shape_cast %5 : vector<21x1xi1> to vector<21x1xi1>
    %7 = vector.broadcast %6 : vector<21x1xi1> to vector<21x1024xi1>
    %8 = vector.broadcast %cst : f32 to vector<21x1024xf32>
    %9 = arith.select %7, %1, %8 : vector<21x1024xi1>, vector<21x1024xf32>
    %cst_1 = arith.constant dense<0xFF800000> : vector<1024xf32>
    %10 = vector.multi_reduction <maximumf>, %9, %cst_1 [0] : vector<21x1024xf32> to vector<1024xf32>
    %11 = vector.shape_cast %10 : vector<1024xf32> to vector<1x1024xf32>
    %12 = vector.broadcast %11 : vector<1x1024xf32> to vector<21x1024xf32>
    %13 = arith.cmpf oeq, %9, %12 : vector<21x1024xf32>
    %14 = vector.broadcast %5 : vector<21x1xi1> to vector<21x1024xi1>
    %15 = arith.andi %14, %13 : vector<21x1024xi1>
    %c5_i32_2 = arith.constant 5 : i32
    %16 = vector.broadcast %c5_i32_2 : i32 to vector<21x1xi32>
    %17 = arith.subi %3, %16 : vector<21x1xi32>
    %c16_i32 = arith.constant 16 : i32
    %18 = vector.shape_cast %17 : vector<21x1xi32> to vector<21x1xi32>
    %19 = vector.broadcast %18 : vector<21x1xi32> to vector<21x1024xi32>
    %20 = vector.broadcast %c16_i32 : i32 to vector<21x1024xi32>
    %21 = arith.select %15, %19, %20 : vector<21x1024xi1>, vector<21x1024xi32>
    %cst_3 = arith.constant dense<2147483647> : vector<1024xi32>
    %22 = vector.multi_reduction <minsi>, %21, %cst_3 [0] : vector<21x1024xi32> to vector<1024xi32>
    %23 = vector.shape_cast %22 : vector<1024xi32> to vector<1x1024xi32>
    %c15_i32 = arith.constant 15 : i32
    %24 = vector.broadcast %c15_i32 : i32 to vector<1x1024xi32>
    %25 = arith.minsi %23, %24 : vector<1x1024xi32>
    %26 = arith.mulf %11, %2 : vector<1x1024xf32>
    %c0_4 = arith.constant 0 : index
    %c0_5 = arith.constant 0 : index
    %27 = vector.load %arg2[%c0_4, %c0_5] : memref<1x1024xf32, #tpu.memory_space<vmem>>, vector<1x1024xf32>
    tpu.vector_store %arg2[%c0_4, %c0_5], %26 {strides = array<i32>} : memref<1x1024xf32, #tpu.memory_space<vmem>>, vector<1x1024xf32>,
    %28 = arith.sitofp %25 : vector<1x1024xi32> to vector<1x1024xf32>
    %c0_6 = arith.constant 0 : index
    %c0_7 = arith.constant 0 : index
    %29 = vector.load %arg3[%c0_6, %c0_7] : memref<1x1024xf32, #tpu.memory_space<vmem>>, vector<1x1024xf32>
    tpu.vector_store %arg3[%c0_6, %c0_7], %28 {strides = array<i32>} : memref<1x1024xf32, #tpu.memory_space<vmem>>, vector<1x1024xf32>,
    return
  }
  func.func @transform_0(%arg0: i32) -> (i32, i32) {
    %c0_i32 = arith.constant 0 : i32
    %c0_i32_0 = arith.constant 0 : i32
    return %arg0, %c0_i32 : i32, i32
  }
  func.func @transform_1(%arg0: i32) -> (i32, i32) {
    %c0_i32 = arith.constant 0 : i32
    %c0_i32_0 = arith.constant 0 : i32
    return %c0_i32, %arg0 : i32, i32
  }
  func.func @transform_2(%arg0: i32) -> (i32, i32) {
    %c0_i32 = arith.constant 0 : i32
    %c0_i32_0 = arith.constant 0 : i32
    return %c0_i32, %arg0 : i32, i32
  }
}

</mosaic_0001>

<bundles_post_ra>
// kernel: tpu_custom_call.1
= control target key start
LH: loop header
LB: loop body
LE: loop exit
PB: predicated region body
PF: predicated region fallthrough
CT: control target
= control target key end

     0   :  { %8 = vsyncpa [#allocation3], 0  ;;  %s1645_s0 = inlined_call_operand.vmem [shape: f32[2048,21], index: 0, kind: input, shape index: {}]   ;;  %s1646_s1 = inlined_call_operand.hbm [shape: f32[1,2048], index: 1, kind: output, shape index: {0}]   ;;  %s1647_s2 = inlined_call_operand.hbm [shape: f32[1,2048], index: 2, kind: output, shape index: {1}]  }
   0x1   :  { %10 = vsyncpa [#allocation3 + $0x1], 0 }
   0x2   :  { %11 = vsyncpa [#allocation5], 0 }
   0x3   :  { %13 = vsyncpa [#allocation5 + $0x1], 0  ;;  %s1220_s9 = smov 0   ;;  %s1222_s10 = smov 0  }
   0x4   :  { %s1224_s11 = smov 0   ;;  %s1226_s12 = smov 0  }
   0x5 LB: > { %s1241_s13 = sadd.s32 4294967295, %s1203_s12   ;;  %s1048_s14 = sadd.s32 4294967294, %s1203_s12   ;;  %s1203_s12 = sphi %s1226_s12, %s1657_s12   ;;  %s1199_s11 = sphi %s1224_s11, %s1656_s11   ;;  %s1195_s10 = sphi %s1222_s10, %s1655_s10   ;;  %s1191_s9 = sphi %s1220_s9, %s1654_s9  }
   0x6   : > { %s1245_s15 = sadd.s32 1, %s1203_s12   ;;  %s52_s16 = sadd.s32 1, %s1199_s11 }
   0x7   : > { %s49_s17 = ssub.s32 %s1203_s12, %s1245_s15  ;;  %p62_p0 = scmp.ne.s32.totalorder %s1199_s11, %s1195_s10 }
   0x8   : > { %p50_p1 = scmp.eq.s32.totalorder %s49_s17, 0  ;;  %p63_p2 = scmp.eq.s32.totalorder %s1241_s13, 1 }
   0x9   : > { %p68_p3 = scmp.ne.s32.totalorder %s1195_s10, %s1191_s9  ;;  %p69_p4 = scmp.eq.s32.totalorder %s1048_s14, 1 }
   0xa   : > { %s1256_s18 = scalar_select %p50_p1, %s1199_s11, %s52_s16  }
   0xb   : > { %p1258_p5 = por %p63_p2, %p62_p0  ;;  %p1262_p6 = por %p69_p4, %p68_p3 }
   0xc   : > { %p1051_p7 = scmp.ge.s32.totalorder %s1203_s12, 1  ;;  %p122_p8 = scmp.lt.s32.totalorder %s1203_s12, 3 }
   0xe   : > { %p123_p9 = pnand %p1051_p7, %p122_p8 }
   0xf   : > { %s1054_s21 = sshll.u32 (!%p123_p9), %s1241_s13, 7  ;;  %s1572_s26 = sand.u32 (!%p123_p9), 1, %s1195_s10  }
  0x10   : > { %126 = sbr.rel (%p123_p9) target bundleno = 510 (0x1fe), region = 24  ;;  %p150_p10 = scmp.lt.s32.totalorder (!%p123_p9), %s1054_s21, 255 }
  0x11   : > { %s1061_s27 = sshll.u32 (!%p123_p9), %s1241_s13, 3  ;;  %s1052_s28 = sshll.u32 (!%p123_p9), %s1572_s26, 3 }
  0x12   : > { %s937_s3 = scalar_lea.hbm (!%p123_p9), %s1646_s1, %s1061_s27  ;;  %s141_s4 = scalar_lea.vmem (!%p123_p9), [#allocation2], %s1052_s28 }
  0x13   : > { %s939_s5 = sshll.u32 (!%p123_p9), %s141_s4, 4  ;;  %s941_s6 = sshll.u32 (!%p123_p9), %s937_s3, 4  ;;  %s940_s5 = int_to_ptr.vmem [resolvable:$true] %s939_s5  ;;  %s942_s6 = int_to_ptr.hbm [resolvable:$true] %s941_s6 }
  0x14   : > { %s922_s7 = scalar_lea.sflag (!%p123_p9), [#allocation3], %s1572_s26  ;;  %s1123_s8 = sshra.s32 (!%p123_p9), %s942_s6, 4  ;;  %s1124_s8 = int_to_ptr.hbm [resolvable:$true] %s1123_s8 }
  0x15   : > { %s1659_s21 = smov (!%p150_p10, %s1054_s21), 255  ;;  %vm579_vm1 = vcmask 1044480   ;;  %s1125_s14 = scalar_lea.hbm %s1124_s8, 8 }
  0x16   : > { %s1055_s22 = sshll.u32 %s1659_s21, 3  ;;  %p1126_p11 = scmp.ne.s32.totalorder %s1124_s8, %s1125_s14 }
  0x17   : > { %s1272_s25 = scalar_lea.vmem %s1645_s0, %s1055_s22  ;;  %s1129_s21 = scalar_lea.hbm %s1646_s1, 16 }
  0x18   : > { %v173_v0 = vld [vmem:[%s1272_s25 + $0x80] sm:$0xff]  ;;  %v174_v2 = vld [vmem:[%s1272_s25 + $0x88] sm:$0xff]  ;;  %v175_v4 = vld [vmem:[%s1272_s25 + $0x90] sm:$0xff]  ;;  %p1127_p12 = pnand %p1126_p11, %p1258_p5  ;;  %p1130_p0 = scmp.lt.s32.totalorder %s1124_s8, %s1646_s1 }
  0x19   : > { %v157_v1 = vld [vmem:[%s1272_s25] sm:$0xff]  ;;  %317 = vxpose.xlu1.b32.start [1/16] (narrow) %v173_v0, 24  ;;  %v158_v3 = vld [vmem:[%s1272_s25 + $0x8] sm:$0xff]  ;;  %v159_v5 = vld [vmem:[%s1272_s25 + $0x10] sm:$0xff]  ;;  %p1131_p1 = scmp.lt.s32.totalorder %s1129_s21, %s1125_s14 }
  0x1a   : > { %285 = vxpose.xlu0.b32.start [1/16] (narrow) %v157_v1, 24  ;;  %v176_v6 = vld [vmem:[%s1272_s25 + $0x98] sm:$0xff]  ;;  %v177_v8 = vld [vmem:[%s1272_s25 + $0xa0] sm:$0xff]  ;;  %v178_v10 = vld [vmem:[%s1272_s25 + $0xa8] sm:$0xff]  ;;  %p1128_p13 = pneg %p1127_p12 }
  0x1b   : > { %v160_v7 = vld [vmem:[%s1272_s25 + $0x18] sm:$0xff]  ;;  %v161_v9 = vld [vmem:[%s1272_s25 + $0x20] sm:$0xff]  ;;  %v162_v11 = vld [vmem:[%s1272_s25 + $0x28] sm:$0xff]  ;;  %p1132_p2 = por %p1131_p1, %p1130_p0 }
  0x1c   : > { %v189_v12 = vld [vmem:[%s1272_s25 + $0x100] sm:$0xff]  ;;  %v179_v13 = vld [vmem:[%s1272_s25 + $0xb0] sm:$0xff]  ;;  %v190_v15 = vld [vmem:[%s1272_s25 + $0x108] sm:$0xff] }
  0x1d   : > { %349 = vxpose.xlu2.b32.start [1/16] (narrow) %v189_v12, 24  ;;  %v163_v14 = vld [vmem:[%s1272_s25 + $0x30] sm:$0xff]  ;;  %v180_v16 = vld [vmem:[%s1272_s25 + $0xb8] sm:$0xff]  ;;  %v181_v19 = vld [vmem:[%s1272_s25 + $0xc0] sm:$0xff]  ;;  %p1133_p3 = pnand %p1132_p2, %p1128_p13 }
  0x1e   : > { %v164_v17 = vld [vmem:[%s1272_s25 + $0x38] sm:$0xff]  ;;  %v191_v18 = vld [vmem:[%s1272_s25 + $0x110] sm:$0xff]  ;;  %v165_v20 = vld [vmem:[%s1272_s25 + $0x40] sm:$0xff] }
  0x1f   : > { %v192_v21 = vld [vmem:[%s1272_s25 + $0x118] sm:$0xff]  ;;  %v182_v22 = vld [vmem:[%s1272_s25 + $0xc8] sm:$0xff]  ;;  %v193_v24 = vld [vmem:[%s1272_s25 + $0x120] sm:$0xff] }
  0x20   : > { %v166_v23 = vld [vmem:[%s1272_s25 + $0x48] sm:$0xff]  ;;  %v183_v25 = vld [vmem:[%s1272_s25 + $0xd0] sm:$0xff]  ;;  %v184_v28 = vld [vmem:[%s1272_s25 + $0xd8] sm:$0xff] }
  0x21   : > { %318 = vxpose.xlu1.b32.cont [2/16] (narrow) %v174_v2, 24  ;;  %v167_v26 = vld [vmem:[%s1272_s25 + $0x50] sm:$0xff]  ;;  %v194_v27 = vld [vmem:[%s1272_s25 + $0x128] sm:$0xff]  ;;  %v168_v29 = vld [vmem:[%s1272_s25 + $0x58] sm:$0xff] }
  0x22   : > { %286 = vxpose.xlu0.b32.cont [2/16] (narrow) %v158_v3, 24  ;;  %v195_v30 = vld [vmem:[%s1272_s25 + $0x130] sm:$0xff]  ;;  %v185_v31 = vld [vmem:[%s1272_s25 + $0xe0] sm:$0xff]  ;;  %v196_v33 = vld [vmem:[%s1272_s25 + $0x138] sm:$0xff] }
  0x23   : > { %v169_v32 = vld [vmem:[%s1272_s25 + $0x60] sm:$0xff]  ;;  %v186_v34 = vld [vmem:[%s1272_s25 + $0xe8] sm:$0xff]  ;;  %v187_v37 = vld [vmem:[%s1272_s25 + $0xf0] sm:$0xff] }
  0x24   : > { %v170_v35 = vld [vmem:[%s1272_s25 + $0x68] sm:$0xff]  ;;  %v197_v36 = vld [vmem:[%s1272_s25 + $0x140] sm:$0xff]  ;;  %v171_v38 = vld [vmem:[%s1272_s25 + $0x70] sm:$0xff] }
  0x25   : > { %350 = vxpose.xlu2.b32.cont [2/16] (narrow) %v190_v15, 24  ;;  %v198_v39 = vld [vmem:[%s1272_s25 + $0x148] sm:$0xff]  ;;  %v188_v40 = vld [vmem:[%s1272_s25 + $0xf8] sm:$0xff]  ;;  %v199_v42 = vld [vmem:[%s1272_s25 + $0x150] sm:$0xff] }
  0x26   : > { %v172_v41 = vld [vmem:[%s1272_s25 + $0x78] sm:$0xff]  ;;  %v221_v43 = vld [vmem:[%s1272_s25 + $0x200] sm:$0xff]  ;;  %v222_v46 = vld [vmem:[%s1272_s25 + $0x208] sm:$0xff] }
  0x27   : > { %v205_v44 = vld [vmem:[%s1272_s25 + $0x180] sm:$0xff]  ;;  %v200_v45 = vld [vmem:[%s1272_s25 + $0x158] sm:$0xff]  ;;  %v206_v47 = vld [vmem:[%s1272_s25 + $0x188] sm:$0xff] }
  0x28   : > { %v201_v48 = vld [vmem:[%s1272_s25 + $0x160] sm:$0xff]  ;;  %v223_v49 = vld [vmem:[%s1272_s25 + $0x210] sm:$0xff]  ;;  %v202_v51 = vld [vmem:[%s1272_s25 + $0x168] sm:$0xff] }
  0x29   : > { %319 = vxpose.xlu1.b32.cont [3/16] (narrow) %v175_v4, 24  ;;  %v207_v50 = vld [vmem:[%s1272_s25 + $0x190] sm:$0xff]  ;;  %v224_v52 = vld [vmem:[%s1272_s25 + $0x218] sm:$0xff]  ;;  %v225_v55 = vld [vmem:[%s1272_s25 + $0x220] sm:$0xff] }
  0x2a   : > { %287 = vxpose.xlu0.b32.cont [3/16] (narrow) %v159_v5, 24  ;;  %v208_v53 = vld [vmem:[%s1272_s25 + $0x198] sm:$0xff]  ;;  %v203_v54 = vld [vmem:[%s1272_s25 + $0x170] sm:$0xff]  ;;  %v209_v56 = vld [vmem:[%s1272_s25 + $0x1a0] sm:$0xff] }
  0x2b   : > { %v204_v57 = vld [vmem:[%s1272_s25 + $0x178] sm:$0xff]  ;;  %v226_v58 = vld [vmem:[%s1272_s25 + $0x228] sm:$0xff]  ;;  %v237_v60 = vld [vmem:[%s1272_s25 + $0x280] sm:$0xff] }
  0x2c   : > { %v210_v59 = vld [vmem:[%s1272_s25 + $0x1a8] sm:$0xff]  ;;  %v227_v61 = vld [vmem:[%s1272_s25 + $0x230] sm:$0xff]  ;;  %v228_v0 = vld [vmem:[%s1272_s25 + $0x238] sm:$0xff] }
  0x2d   : > { %351 = vxpose.xlu2.b32.cont [3/16] (narrow) %v191_v18, 24  ;;  %v211_v62 = vld [vmem:[%s1272_s25 + $0x1b0] sm:$0xff]  ;;  %v238_v63 = vld [vmem:[%s1272_s25 + $0x288] sm:$0xff]  ;;  %v212_v1 = vld [vmem:[%s1272_s25 + $0x1b8] sm:$0xff] }
  0x2e   : > { %v239_v2 = vld [vmem:[%s1272_s25 + $0x290] sm:$0xff]  ;;  %v229_v3 = vld [vmem:[%s1272_s25 + $0x240] sm:$0xff]  ;;  %v240_v5 = vld [vmem:[%s1272_s25 + $0x298] sm:$0xff] }
  0x2f   : > { %v213_v4 = vld [vmem:[%s1272_s25 + $0x1c0] sm:$0xff]  ;;  %v232_v12 = vld [vmem:[%s1272_s25 + $0x258] sm:$0xff]  ;;  %v234_v18 = vld [vmem:[%s1272_s25 + $0x268] sm:$0xff] }
  0x30   : > { %v233_v15 = vld [vmem:[%s1272_s25 + $0x260] sm:$0xff] }
  0x31   : > { %320 = vxpose.xlu1.b32.cont [4/16] (narrow) %v176_v6, 24  ;;  %v230_v6 = vld [vmem:[%s1272_s25 + $0x248] sm:$0xff] }
  0x32   : > { %288 = vxpose.xlu0.b32.cont [4/16] (narrow) %v160_v7, 24  ;;  %v214_v7 = vld [vmem:[%s1272_s25 + $0x1c8] sm:$0xff] }
  0x35   : > { %352 = vxpose.xlu2.b32.cont [4/16] (narrow) %v192_v21, 24  ;;  %v235_v21 = vld [vmem:[%s1272_s25 + $0x270] sm:$0xff] }
  0x39   : > { %321 = vxpose.xlu1.b32.cont [5/16] (narrow) %v177_v8, 24  ;;  %v241_v8 = vld [vmem:[%s1272_s25 + $0x2a0] sm:$0xff] }
  0x3a   : > { %289 = vxpose.xlu0.b32.cont [5/16] (narrow) %v161_v9, 24  ;;  %v231_v9 = vld [vmem:[%s1272_s25 + $0x250] sm:$0xff] }
  0x3d   : > { %353 = vxpose.xlu2.b32.cont [5/16] (narrow) %v193_v24, 24  ;;  %v236_v24 = vld [vmem:[%s1272_s25 + $0x278] sm:$0xff] }
  0x41   : > { %322 = vxpose.xlu1.b32.cont [6/16] (narrow) %v178_v10, 24  ;;  %v215_v10 = vld [vmem:[%s1272_s25 + $0x1d0] sm:$0xff] }
  0x42   : > { %290 = vxpose.xlu0.b32.cont [6/16] (narrow) %v162_v11, 24  ;;  %v242_v11 = vld [vmem:[%s1272_s25 + $0x2a8] sm:$0xff] }
  0x45   : > { %354 = vxpose.xlu2.b32.cont [6/16] (narrow) %v194_v27, 24  ;;  %v269_v27 = vld [vmem:[%s1272_s25 + $0x380] sm:$0xff] }
  0x49   : > { %323 = vxpose.xlu1.b32.cont [7/16] (narrow) %v179_v13, 24  ;;  %v216_v13 = vld [vmem:[%s1272_s25 + $0x1d8] sm:$0xff] }
  0x4a   : > { %291 = vxpose.xlu0.b32.cont [7/16] (narrow) %v163_v14, 24  ;;  %v243_v14 = vld [vmem:[%s1272_s25 + $0x2b0] sm:$0xff] }
  0x4d   : > { %355 = vxpose.xlu2.b32.cont [7/16] (narrow) %v195_v30, 24  ;;  %v270_v30 = vld [vmem:[%s1272_s25 + $0x388] sm:$0xff] }
  0x51   : > { %324 = vxpose.xlu1.b32.cont [8/16] (narrow) %v180_v16, 24  ;;  %v217_v16 = vld [vmem:[%s1272_s25 + $0x1e0] sm:$0xff] }
  0x52   : > { %292 = vxpose.xlu0.b32.cont [8/16] (narrow) %v164_v17, 24  ;;  %v244_v17 = vld [vmem:[%s1272_s25 + $0x2b8] sm:$0xff] }
  0x55   : > { %356 = vxpose.xlu2.b32.cont [8/16] (narrow) %v196_v33, 24  ;;  %v271_v33 = vld [vmem:[%s1272_s25 + $0x390] sm:$0xff] }
  0x59   : > { %325 = vxpose.xlu1.b32.cont [9/16] (narrow) %v181_v19, 24  ;;  %v218_v19 = vld [vmem:[%s1272_s25 + $0x1e8] sm:$0xff] }
  0x5a   : > { %293 = vxpose.xlu0.b32.cont [9/16] (narrow) %v165_v20, 24  ;;  %v245_v20 = vld [vmem:[%s1272_s25 + $0x2c0] sm:$0xff] }
  0x5d   : > { %357 = vxpose.xlu2.b32.cont [9/16] (narrow) %v197_v36, 24  ;;  %v250_v36 = vld [vmem:[%s1272_s25 + $0x2e8] sm:$0xff] }
  0x61   : > { %326 = vxpose.xlu1.b32.cont [10/16] (narrow) %v182_v22, 24  ;;  %v219_v22 = vld [vmem:[%s1272_s25 + $0x1f0] sm:$0xff] }
  0x62   : > { %294 = vxpose.xlu0.b32.cont [10/16] (narrow) %v166_v23, 24  ;;  %v246_v23 = vld [vmem:[%s1272_s25 + $0x2c8] sm:$0xff] }
  0x65   : > { %358 = vxpose.xlu2.b32.cont [10/16] (narrow) %v198_v39, 24  ;;  %v256_v39 = vld [vmem:[%s1272_s25 + $0x318] sm:$0xff] }
  0x69   : > { %327 = vxpose.xlu1.b32.cont [11/16] (narrow) %v183_v25, 24  ;;  %v220_v25 = vld [vmem:[%s1272_s25 + $0x1f8] sm:$0xff] }
  0x6a   : > { %295 = vxpose.xlu0.b32.cont [11/16] (narrow) %v167_v26, 24  ;;  %v247_v26 = vld [vmem:[%s1272_s25 + $0x2d0] sm:$0xff] }
  0x6d   : > { %359 = vxpose.xlu2.b32.cont [11/16] (narrow) %v199_v42, 24  ;;  %v251_v42 = vld [vmem:[%s1272_s25 + $0x2f0] sm:$0xff] }
  0x71   : > { %328 = vxpose.xlu1.b32.cont [12/16] (narrow) %v184_v28, 24  ;;  %v253_v28 = vld [vmem:[%s1272_s25 + $0x300] sm:$0xff] }
  0x72   : > { %296 = vxpose.xlu0.b32.cont [12/16] (narrow) %v168_v29, 24  ;;  %v248_v29 = vld [vmem:[%s1272_s25 + $0x2d8] sm:$0xff] }
  0x75   : > { %360 = vxpose.xlu2.b32.cont [12/16] (narrow) %v200_v45, 24  ;;  %v257_v45 = vld [vmem:[%s1272_s25 + $0x320] sm:$0xff] }
  0x79   : > { %329 = vxpose.xlu1.b32.cont [13/16] (narrow) %v185_v31, 24  ;;  %v254_v31 = vld [vmem:[%s1272_s25 + $0x308] sm:$0xff] }
  0x7a   : > { %297 = vxpose.xlu0.b32.cont [13/16] (narrow) %v169_v32, 24  ;;  %v249_v32 = vld [vmem:[%s1272_s25 + $0x2e0] sm:$0xff] }
  0x7d   : > { %361 = vxpose.xlu2.b32.cont [13/16] (narrow) %v201_v48, 24 }
  0x81   : > { %330 = vxpose.xlu1.b32.cont [14/16] (narrow) %v186_v34, 24  ;;  %v255_v34 = vld [vmem:[%s1272_s25 + $0x310] sm:$0xff] }
  0x82   : > { %298 = vxpose.xlu0.b32.cont [14/16] (narrow) %v170_v35, 24 }
  0x85   : > { %362 = vxpose.xlu2.b32.cont [14/16] (narrow) %v202_v51, 24 }
  0x89   : > { %331 = vxpose.xlu1.b32.cont [15/16] (narrow) %v187_v37, 24  ;;  %v541_v37 = vlaneseq }
  0x8a   : > { %299 = vxpose.xlu0.b32.cont [15/16] (narrow) %v171_v38, 24  ;;  %v272_v38 = vld [vmem:[%s1272_s25 + $0x398] sm:$0xff] }
  0x8d   : > { %363 = vxpose.xlu2.b32.cont [15/16] (narrow) %v203_v54, 24  ;;  %v258_v54 = vld [vmem:[%s1272_s25 + $0x328] sm:$0xff] }
  0x91   : > { %332 = vxpose.xlu1.b32.end [16/16] (narrow) %v188_v40, 24  ;;  %v1376_v40 = vshrl.u32 %v541_v37, 7 }
  0x92   : > { %300 = vxpose.xlu0.b32.end [16/16] (narrow) %v172_v41, 24 }
  0x93   : > { %vm545_vm0 = vcmp.ge.s32.totalorder %v1376_v40, 5 }
  0x95   : > { %364 = vxpose.xlu2.b32.end [16/16] (narrow) %v204_v57, 24 }
  0x99   : > { %413 = vxpose.xlu1.b32.start [1/16] (narrow) %v221_v43, 24 }
  0x9a   : > { %381 = vxpose.xlu0.b32.start [1/16] (narrow) %v205_v44, 24  ;;  %v273_v44 = vld [vmem:[%s1272_s25 + $0x3a0] sm:$0xff] }
  0x9d   : > { %445 = vxpose.xlu2.b32.start [1/16] (narrow) %v237_v60, 24  ;;  %v543_v60 = vadd.s32 8, %v1376_v40 }
  0xa1   : > { %414 = vxpose.xlu1.b32.cont [2/16] (narrow) %v222_v46, 24 }
  0xa2   : > { %382 = vxpose.xlu0.b32.cont [2/16] (narrow) %v206_v47, 24 }
  0xa5   : > { %446 = vxpose.xlu2.b32.cont [2/16] (narrow) %v238_v63, 24 }
  0xa9   : > { %415 = vxpose.xlu1.b32.cont [3/16] (narrow) %v223_v49, 24  ;;  %v252_v49 = vld [vmem:[%s1272_s25 + $0x2f8] sm:$0xff] }
  0xaa   : > { %383 = vxpose.xlu0.b32.cont [3/16] (narrow) %v207_v50, 24 }
  0xad   : > { %447 = vxpose.xlu2.b32.cont [3/16] (narrow) %v239_v2, 24 }
  0xb1   : > { %416 = vxpose.xlu1.b32.cont [4/16] (narrow) %v224_v52, 24 }
  0xb2   : > { %384 = vxpose.xlu0.b32.cont [4/16] (narrow) %v208_v53, 24  ;;  %v274_v53 = vld [vmem:[%s1272_s25 + $0x3a8] sm:$0xff] }
  0xb5   : > { %448 = vxpose.xlu2.b32.cont [4/16] (narrow) %v240_v5, 24 }
  0xb6   : > { %v1386_v51 = vpop.trf.xlu2 }
  0xb9   : > { %417 = vxpose.xlu1.b32.cont [5/16] (narrow) %v225_v55, 24 }
  0xba   : > { %385 = vxpose.xlu0.b32.cont [5/16] (narrow) %v209_v56, 24 }
  0xbd   : > { %449 = vxpose.xlu2.b32.cont [5/16] (narrow) %v241_v8, 24  ;;  %v1390_v57 = vpop.trf.xlu1 }
  0xbe   : > { %v301_v35 = vpop.trf.xlu0 }
  0xbf   : > { %v554_v43 = vsel %vm545_vm0, %v301_v35, -inf }
  0xc1   : > { %418 = vxpose.xlu1.b32.cont [6/16] (narrow) %v226_v58, 24 }
  0xc2   : > { %386 = vxpose.xlu0.b32.cont [6/16] (narrow) %v210_v59, 24 }
  0xc5   : > { %450 = vxpose.xlu2.b32.cont [6/16] (narrow) %v242_v11, 24 }
  0xc6   : > { %v302_v41 = vpop.trf.xlu0 }
  0xc7   : > { %v578_v46 = vmax.f32 %v554_v43, %v302_v41 }
  0xc9   : > { %419 = vxpose.xlu1.b32.cont [7/16] (narrow) %v227_v61, 24  ;;  %v544_v61 = vadd.s32 16, %v1376_v40 }
  0xca   : > { %387 = vxpose.xlu0.b32.cont [7/16] (narrow) %v211_v62, 24  ;;  %v1396_v62 = vpop.trf.xlu2 }
  0xcb   : > { %v1407_v5 = vadd.s32 4294967291, %v544_v61  ;;  %v278_v61 = vld [vmem:[%s1272_s25 + $0x3c8] sm:$0xff] }
  0xcd   : > { %451 = vxpose.xlu2.b32.cont [7/16] (narrow) %v243_v14, 24 }
  0xce   : > { %v303_v47 = vpop.trf.xlu0 }
  0xcf   : > { %v580_v48 = vsel %vm579_vm1, %v303_v47, -inf }
  0xd0   : > { %v581_v50 = vmax.f32 %v578_v46, %v580_v48 }
  0xd1   : > { %420 = vxpose.xlu1.b32.cont [8/16] (narrow) %v228_v0, 24  ;;  %v275_v0 = vld [vmem:[%s1272_s25 + $0x3b0] sm:$0xff] }
  0xd2   : > { %388 = vxpose.xlu0.b32.cont [8/16] (narrow) %v212_v1, 24  ;;  %v582_v52 = vrot.slane %v581_v50, 4  ;;  %v259_v1 = vld [vmem:[%s1272_s25 + $0x330] sm:$0xff] }
  0xd4   : > { %v583_v55 = vmax.f32 %v581_v50, %v582_v52 }
  0xd5   : > { %452 = vxpose.xlu2.b32.cont [8/16] (narrow) %v244_v17, 24  ;;  %v367_v17 = vpop.trf.xlu2 }
  0xd6   : > { %v584_v56 = vrot.slane %v583_v55, 2 }
  0xd8   : > { %v585_v59 = vmax.f32 %v583_v55, %v584_v56 }
  0xd9   : > { %421 = vxpose.xlu1.b32.cont [9/16] (narrow) %v229_v3, 24  ;;  %v1403_v3 = vsel %vm545_vm0, %v1386_v51, -inf }
  0xda   : > { %389 = vxpose.xlu0.b32.cont [9/16] (narrow) %v213_v4, 24  ;;  %v586_v63 = vrot.slane %v585_v59, 1  ;;  %v1405_v4 = vadd.s32 4294967291, %v543_v60 }
  0xdc   : > { %v587_v2 = vmax.f32 %v585_v59, %v586_v63  ;;  %v262_v63 = vld [vmem:[%s1272_s25 + $0x348] sm:$0xff] }
  0xdd   : > { %453 = vxpose.xlu2.b32.cont [9/16] (narrow) %v245_v20, 24  ;;  %v276_v20 = vld [vmem:[%s1272_s25 + $0x3b8] sm:$0xff] }
  0xde   : > { %vm651_vm2 = vcmp.eq.f32.partialorder %v554_v43, %v587_v2  ;;  %vm659_vm3 = vcmp.eq.f32.partialorder %v302_v41, %v587_v2  ;;  %vm667_vm4 = vcmp.eq.f32.partialorder %v303_v47, %v587_v2  ;;  %v854_v11 = vmul.f32 %v587_v2, %v301_v35 }
  0xdf   : > { %vm675_vm5 = vmand %vm545_vm0, %vm651_vm2 }
  0xe0   : > { %870 = vst [vmem:[#allocation1] sm:$0xff] %v854_v11 }
  0xe1   : > { %422 = vxpose.xlu1.b32.cont [10/16] (narrow) %v230_v6, 24  ;;  %v1410_v6 = vadd.s32 4294967291, %v1376_v40 }
  0xe2   : > { %390 = vxpose.xlu0.b32.cont [10/16] (narrow) %v214_v7, 24  ;;  %v1412_v7 = vpop.trf.xlu1 }
  0xe5   : > { %454 = vxpose.xlu2.b32.cont [10/16] (narrow) %v246_v23, 24 }
  0xe9   : > { %423 = vxpose.xlu1.b32.cont [11/16] (narrow) %v231_v9, 24  ;;  %v710_v9 = vsel %vm659_vm3, %v1405_v4, 16 }
  0xea   : > { %391 = vxpose.xlu0.b32.cont [11/16] (narrow) %v215_v10, 24  ;;  %v718_v10 = vsel %vm667_vm4, %v1407_v5, 16 }
  0xeb   : > { %v728_v14 = vsel %vm579_vm1, %v718_v10, 2147483647 }
  0xed   : > { %455 = vxpose.xlu2.b32.cont [11/16] (narrow) %v247_v26, 24 }
  0xf1   : > { %424 = vxpose.xlu1.b32.cont [12/16] (narrow) %v232_v12, 24  ;;  %v597_v12 = vmax.f32 %v1403_v3, %v1396_v62 }
  0xf2   : > { %392 = vxpose.xlu0.b32.cont [12/16] (narrow) %v216_v13, 24  ;;  %v702_v13 = vsel %vm675_vm5, %v1410_v6, 16 }
  0xf3   : > { %vm726_vm6 = vcmp.lt.s32.totalorder %v702_v13, %v710_v9 }
  0xf5   : > { %456 = vxpose.xlu2.b32.cont [12/16] (narrow) %v248_v29, 24 }
  0xf9   : > { %425 = vxpose.xlu1.b32.cont [13/16] (narrow) %v233_v15, 24  ;;  %v1427_v15 = vsel %vm545_vm0, %v1390_v57, -inf }
  0xfa   : > { %393 = vxpose.xlu0.b32.cont [13/16] (narrow) %v217_v16, 24 }
  0xfd   : > { %457 = vxpose.xlu2.b32.cont [13/16] (narrow) %v249_v32, 24 }
 0x101   : > { %426 = vxpose.xlu1.b32.cont [14/16] (narrow) %v234_v18, 24  ;;  %v727_v18 = vsel %vm726_vm6, %v702_v13, %v710_v9 }
 0x102   : > { %394 = vxpose.xlu0.b32.cont [14/16] (narrow) %v218_v19, 24  ;;  %v598_v19 = vsel %vm579_vm1, %v367_v17, -inf  ;;  %vm729_vm7 = vcmp.lt.s32.totalorder %v727_v18, %v728_v14 }
 0x103   : > { %v730_v23 = vsel %vm729_vm7, %v727_v18, %v728_v14 }
 0x104   : > { %v731_v29 = vrot.slane %v730_v23, 4 }
 0x105   : > { %458 = vxpose.xlu2.b32.cont [14/16] (narrow) %v250_v36, 24 }
 0x106   : > { %vm732_vm8 = vcmp.lt.s32.totalorder %v730_v23, %v731_v29 }
 0x109   : > { %427 = vxpose.xlu1.b32.cont [15/16] (narrow) %v235_v21, 24  ;;  %v260_v21 = vld [vmem:[%s1272_s25 + $0x338] sm:$0xff] }
 0x10a   : > { %395 = vxpose.xlu0.b32.cont [15/16] (narrow) %v219_v22, 24  ;;  %v599_v22 = vmax.f32 %v597_v12, %v598_v19 }
 0x10c   : > { %v600_v26 = vrot.slane %v599_v22, 4 }
 0x10d   : > { %459 = vxpose.xlu2.b32.cont [15/16] (narrow) %v251_v42, 24 }
 0x111   : > { %428 = vxpose.xlu1.b32.end [16/16] (narrow) %v236_v24, 24  ;;  %v588_v24 = vmax.f32 %v1427_v15, %v1412_v7 }
 0x112   : > { %396 = vxpose.xlu0.b32.end [16/16] (narrow) %v220_v25, 24 }
 0x115   : > { %460 = vxpose.xlu2.b32.end [16/16] (narrow) %v252_v49, 24 }
 0x119   : > { %509 = vxpose.xlu1.b32.start [1/16] (narrow) %v269_v27, 24  ;;  %v1441_v27 = vpop.trf.xlu1 }
 0x11a   : > { %477 = vxpose.xlu0.b32.start [1/16] (narrow) %v253_v28, 24 }
 0x121   : > { %510 = vxpose.xlu1.b32.cont [2/16] (narrow) %v270_v30, 24  ;;  %v601_v30 = vmax.f32 %v599_v22, %v600_v26 }
 0x122   : > { %478 = vxpose.xlu0.b32.cont [2/16] (narrow) %v254_v31, 24  ;;  %v589_v31 = vsel %vm579_vm1, %v1441_v27, -inf }
 0x123   : > { %v602_v35 = vrot.slane %v601_v30, 2 }
 0x125   : > { %v603_v41 = vmax.f32 %v601_v30, %v602_v35 }
 0x129   : > { %511 = vxpose.xlu1.b32.cont [3/16] (narrow) %v271_v33, 24  ;;  %v590_v33 = vmax.f32 %v588_v24, %v589_v31 }
 0x12a   : > { %479 = vxpose.xlu0.b32.cont [3/16] (narrow) %v255_v34, 24 }
 0x12b   : > { %v591_v36 = vrot.slane %v590_v33, 4 }
 0x12d   : > { %v592_v42 = vmax.f32 %v590_v33, %v591_v36 }
 0x12f   : > { %v593_v46 = vrot.slane %v592_v42, 2 }
 0x131   : > { %512 = vxpose.xlu1.b32.cont [4/16] (narrow) %v272_v38, 24  ;;  %v277_v38 = vld [vmem:[%s1272_s25 + $0x3c0] sm:$0xff]  ;;  %v594_v50 = vmax.f32 %v592_v42, %v593_v46 }
 0x132   : > { %480 = vxpose.xlu0.b32.cont [4/16] (narrow) %v256_v39, 24  ;;  %v261_v39 = vld [vmem:[%s1272_s25 + $0x340] sm:$0xff] }
 0x133   : > { %v595_v60 = vrot.slane %v594_v50, 1 }
 0x135   : > { %v596_v2 = vmax.f32 %v594_v50, %v595_v60 }
 0x137   : > { %vm652_vm2 = vcmp.eq.f32.partialorder %v1427_v15, %v596_v2  ;;  %vm660_vm3 = vcmp.eq.f32.partialorder %v1412_v7, %v596_v2  ;;  %vm668_vm4 = vcmp.eq.f32.partialorder %v1441_v27, %v596_v2 }
 0x138   : > { %vm676_vm5 = vmand %vm545_vm0, %vm652_vm2  ;;  %v711_v14 = vsel %vm660_vm3, %v1405_v4, 16  ;;  %v719_v18 = vsel %vm668_vm4, %v1407_v5, 16 }
 0x139   : > { %513 = vxpose.xlu1.b32.cont [5/16] (narrow) %v273_v44, 24  ;;  %v604_v44 = vrot.slane %v603_v41, 1  ;;  %v703_v7 = vsel %vm676_vm5, %v1410_v6, 16  ;;  %v742_v19 = vsel %vm579_vm1, %v719_v18, 2147483647 }
 0x13a   : > { %481 = vxpose.xlu0.b32.cont [5/16] (narrow) %v257_v45, 24  ;;  %v1451_v45 = vsel %vm732_vm8, %v730_v23, %v731_v29  ;;  %vm740_vm7 = vcmp.lt.s32.totalorder %v703_v7, %v711_v14  ;;  %v263_v23 = vld [vmem:[%s1272_s25 + $0x350] sm:$0xff] }
 0x13b   : > { %v605_v49 = vmax.f32 %v603_v41, %v604_v44 }
 0x13d   : > { %v1453_v48 = vpop.trf.xlu1  ;;  %vm653_vm9 = vcmp.eq.f32.partialorder %v1403_v3, %v605_v49  ;;  %vm661_vm10 = vcmp.eq.f32.partialorder %v1396_v62, %v605_v49  ;;  %vm669_vm11 = vcmp.eq.f32.partialorder %v367_v17, %v605_v49  ;;  %v856_v59 = vmul.f32 %v605_v49, %v1386_v51  ;;  %v264_v49 = vld [vmem:[%s1272_s25 + $0x358] sm:$0xff] }
 0x13e   : > { %v1392_v58 = vpop.trf.xlu0  ;;  %vm677_vm12 = vmand %vm545_vm0, %vm653_vm9  ;;  %v712_v55 = vsel %vm661_vm10, %v1405_v4, 16  ;;  %v720_v56 = vsel %vm669_vm11, %v1407_v5, 16  ;;  %v1477_v51 = vsel %vm545_vm0, %v1453_v48, -inf  ;;  %v855_v17 = vmul.f32 %v596_v2, %v1390_v57 }
 0x13f   : > { %v1432_v16 = vsel %vm545_vm0, %v1392_v58, -inf  ;;  %872 = vst [vmem:[#allocation1 + $0x12] sm:$0xff] %v856_v59 }
 0x140   : > { %871 = vst [vmem:[#allocation1 + $0x9] sm:$0xff] %v855_v17  ;;  %v281_v17 = vld [vmem:[%s1272_s25 + $0x3e0] sm:$0xff] }
 0x141   : > { %514 = vxpose.xlu1.b32.cont [6/16] (narrow) %v274_v53, 24  ;;  %v734_v53 = vrot.slane %v1451_v45, 2 }
 0x142   : > { %482 = vxpose.xlu0.b32.cont [6/16] (narrow) %v258_v54, 24  ;;  %v1458_v54 = vpop.trf.xlu2 }
 0x143   : > { %vm1470_vm14 = vcmp.lt.s32.totalorder %v1451_v45, %v734_v53  ;;  %v1484_v11 = vsel %vm545_vm0, %v1458_v54, -inf }
 0x144   : > { %v736_v29 = vsel %vm1470_vm14, %v1451_v45, %v734_v53 }
 0x145   : > { %v1486_v12 = vpop.trf.xlu1 }
 0x146   : > { %v1414_v8 = vpop.trf.xlu0  ;;  %v615_v33 = vmax.f32 %v1477_v51, %v1486_v12 }
 0x147   : > { %v606_v25 = vmax.f32 %v1432_v16, %v1414_v8 }
 0x149   : > { %515 = vxpose.xlu1.b32.cont [7/16] (narrow) %v275_v0, 24  ;;  %v704_v0 = vsel %vm677_vm12, %v1410_v6, 16 }
 0x14a   : > { %483 = vxpose.xlu0.b32.cont [7/16] (narrow) %v259_v1, 24  ;;  %v756_v1 = vsel %vm579_vm1, %v720_v56, 2147483647  ;;  %vm754_vm13 = vcmp.lt.s32.totalorder %v704_v0, %v712_v55  ;;  %v1501_v57 = vpop.trf.xlu2 }
 0x14b   : > { %v755_v9 = vsel %vm754_vm13, %v704_v0, %v712_v55  ;;  %v624_v36 = vmax.f32 %v1484_v11, %v1501_v57 }
 0x14c   : > { %vm757_vm15 = vcmp.lt.s32.totalorder %v755_v9, %v756_v1 }
 0x14d   : > { %v758_v13 = vsel %vm757_vm15, %v755_v9, %v756_v1 }
 0x14e   : > { %v1443_v28 = vpop.trf.xlu0  ;;  %v759_v15 = vrot.slane %v758_v13, 4 }
 0x14f   : > { %v607_v32 = vsel %vm579_vm1, %v1443_v28, -inf }
 0x150   : > { %v608_v34 = vmax.f32 %v606_v25, %v607_v32  ;;  %vm760_vm11 = vcmp.lt.s32.totalorder %v758_v13, %v759_v15 }
 0x151   : > { %516 = vxpose.xlu1.b32.cont [8/16] (narrow) %v276_v20, 24  ;;  %v741_v20 = vsel %vm740_vm7, %v703_v7, %v711_v14  ;;  %v761_v24 = vsel %vm760_vm11, %v758_v13, %v759_v15  ;;  %v265_v15 = vld [vmem:[%s1272_s25 + $0x360] sm:$0xff] }
 0x152   : > { %484 = vxpose.xlu0.b32.cont [8/16] (narrow) %v260_v21, 24  ;;  %v609_v37 = vrot.slane %v608_v34, 4  ;;  %vm743_vm12 = vcmp.lt.s32.totalorder %v741_v20, %v742_v19  ;;  %v1519_v42 = vpop.trf.xlu2 }
 0x153   : > { %v744_v26 = vsel %vm743_vm12, %v741_v20, %v742_v19  ;;  %v625_v45 = vsel %vm579_vm1, %v1519_v42, -inf }
 0x154   : > { %v610_v43 = vmax.f32 %v608_v34, %v609_v37  ;;  %v745_v30 = vrot.slane %v744_v26, 4 }
 0x156   : > { %v611_v47 = vrot.slane %v610_v43, 2  ;;  %vm746_vm3 = vcmp.lt.s32.totalorder %v744_v26, %v745_v30 }
 0x158   : > { %v612_v52 = vmax.f32 %v610_v43, %v611_v47  ;;  %v280_v47 = vld [vmem:[%s1272_s25 + $0x3d8] sm:$0xff] }
 0x159   : > { %517 = vxpose.xlu1.b32.cont [9/16] (narrow) %v277_v38, 24  ;;  %v747_v38 = vsel %vm746_vm3, %v744_v26, %v745_v30 }
 0x15a   : > { %485 = vxpose.xlu0.b32.cont [9/16] (narrow) %v261_v39, 24  ;;  %v613_v62 = vrot.slane %v612_v52, 1  ;;  %v1517_v39 = vpop.trf.xlu1  ;;  %v748_v41 = vrot.slane %v747_v38, 2 }
 0x15b   : > { %v616_v43 = vsel %vm579_vm1, %v1517_v39, -inf }
 0x15c   : > { %v614_v10 = vmax.f32 %v612_v52, %v613_v62  ;;  %v617_v46 = vmax.f32 %v615_v33, %v616_v43  ;;  %vm749_vm5 = vcmp.lt.s32.totalorder %v747_v38, %v748_v41  ;;  %v626_v52 = vmax.f32 %v624_v36, %v625_v45 }
 0x15d   : > { %v750_v53 = vsel %vm749_vm5, %v747_v38, %v748_v41 }
 0x15e   : > { %vm654_vm6 = vcmp.eq.f32.partialorder %v1432_v16, %v614_v10  ;;  %vm662_vm8 = vcmp.eq.f32.partialorder %v1414_v8, %v614_v10  ;;  %vm670_vm9 = vcmp.eq.f32.partialorder %v1443_v28, %v614_v10  ;;  %v279_v16 = vld [vmem:[%s1272_s25 + $0x3d0] sm:$0xff]  ;;  %v762_v8 = vrot.slane %v761_v24, 2 }
 0x15f   : > { %vm678_vm10 = vmand %vm545_vm0, %vm654_vm6  ;;  %v713_v22 = vsel %vm662_vm8, %v1405_v4, 16  ;;  %v721_v25 = vsel %vm670_vm9, %v1407_v5, 16  ;;  %v857_v31 = vmul.f32 %v614_v10, %v1392_v58  ;;  %v737_v58 = vrot.slane %v736_v29, 1 }
 0x160   : > { %v705_v21 = vsel %vm678_vm10, %v1410_v6, 16  ;;  %v770_v28 = vsel %vm579_vm1, %v721_v25, 2147483647  ;;  %vm763_vm2 = vcmp.lt.s32.totalorder %v761_v24, %v762_v8  ;;  %v618_v55 = vrot.slane %v617_v46, 4 }
 0x161   : > { %518 = vxpose.xlu1.b32.cont [10/16] (narrow) %v278_v61, 24  ;;  %vm768_vm13 = vcmp.lt.s32.totalorder %v705_v21, %v713_v22  ;;  %v764_v34 = vsel %vm763_vm2, %v761_v24, %v762_v8  ;;  %873 = vst [vmem:[#allocation1 + $0x1b] sm:$0xff] %v857_v31  ;;  %vm738_vm6 = vcmp.lt.s32.totalorder %v736_v29, %v737_v58  ;;  %v751_v56 = vrot.slane %v750_v53, 1 }
 0x162   : > { %486 = vxpose.xlu0.b32.cont [10/16] (narrow) %v262_v63, 24  ;;  %v769_v27 = vsel %vm768_vm13, %v705_v21, %v713_v22  ;;  %v765_v37 = vrot.slane %v764_v34, 1  ;;  %v627_v59 = vrot.slane %v626_v52, 4  ;;  %v619_v63 = vmax.f32 %v617_v46, %v618_v55  ;;  %v283_v46 = vld [vmem:[%s1272_s25 + $0x3f0] sm:$0xff] }
 0x163   : > { %vm771_vm15 = vcmp.lt.s32.totalorder %v769_v27, %v770_v28  ;;  %vm752_vm8 = vcmp.lt.s32.totalorder %v750_v53, %v751_v56  ;;  %v739_v62 = vsel %vm738_vm6, %v736_v29, %v737_v58 }
 0x164   : > { %v772_v32 = vsel %vm771_vm15, %v769_v27, %v770_v28  ;;  %vm766_vm4 = vcmp.lt.s32.totalorder %v764_v34, %v765_v37  ;;  %v628_v1 = vmax.f32 %v626_v52, %v627_v59  ;;  %v753_v2 = vsel %vm752_vm8, %v750_v53, %v751_v56  ;;  %v282_v28 = vld [vmem:[%s1272_s25 + $0x3e8] sm:$0xff] }
 0x165   : > { %v773_v35 = vrot.slane %v772_v32, 4  ;;  %v767_v60 = vsel %vm766_vm4, %v764_v34, %v765_v37  ;;  %v620_v3 = vrot.slane %v619_v63, 2  ;;  %vm840_vm10 = vcmp.lt.s32.totalorder %v753_v2, 15 }
 0x166   : > { %vm842_vm9 = vcmp.lt.s32.totalorder %v767_v60, 15  ;;  %v629_v9 = vrot.slane %v628_v1, 2  ;;  %v841_v14 = vsel %vm840_vm10, %v753_v2, 15  ;;  %vm838_vm13 = vcmp.lt.s32.totalorder %v739_v62, 15 }
 0x167   : > { %vm774_vm14 = vcmp.lt.s32.totalorder %v772_v32, %v773_v35  ;;  %v621_v13 = vmax.f32 %v619_v63, %v620_v3  ;;  %v843_v18 = vsel %vm842_vm9, %v767_v60, 15  ;;  %v839_v24 = vsel %vm838_vm13, %v739_v62, 15  ;;  %v284_v63 = vld [vmem:[%s1272_s25 + $0x3f8] sm:$0xff] }
 0x168   : > { %v775_v44 = vsel %vm774_vm14, %v772_v32, %v773_v35  ;;  %v630_v7 = vmax.f32 %v628_v1, %v629_v9  ;;  %v884_v25 = vcvt.s32.f32 %v843_v18  ;;  %v882_v33 = vcvt.s32.f32 %v839_v24 }
 0x169   : > { %519 = vxpose.xlu1.b32.cont [11/16] (narrow) %v279_v16, 24  ;;  %v776_v50 = vrot.slane %v775_v44, 2  ;;  %v622_v20 = vrot.slane %v621_v13, 1  ;;  %v883_v16 = vcvt.s32.f32 %v841_v14  ;;  %vm907_vm13 = vcmask 1042434  }
 0x16a   : > { %487 = vxpose.xlu0.b32.cont [11/16] (narrow) %v263_v23, 24  ;;  %v631_v21 = vrot.slane %v630_v7, 1  ;;  %v899_v36 = vrot.slane %v884_v25, 6 }
 0x16b   : > { %vm777_vm7 = vcmp.lt.s32.totalorder %v775_v44, %v776_v50  ;;  %v623_v22 = vmax.f32 %v621_v13, %v622_v20  ;;  %v898_v35 = vrot.slane %v883_v16, 7 }
 0x16c   : > { %v778_v61 = vsel %vm777_vm7, %v775_v44, %v776_v50  ;;  %v632_v23 = vmax.f32 %v630_v7, %v631_v21 }
 0x16d   : > { %v779_v0 = vrot.slane %v778_v61, 1  ;;  %vm655_vm15 = vcmp.eq.f32.partialorder %v1477_v51, %v623_v22  ;;  %vm663_vm2 = vcmp.eq.f32.partialorder %v1486_v12, %v623_v22  ;;  %vm671_vm3 = vcmp.eq.f32.partialorder %v1517_v39, %v623_v22 }
 0x16e   : > { %v858_v26 = vmul.f32 %v623_v22, %v1453_v48  ;;  %vm656_vm14 = vcmp.eq.f32.partialorder %v1484_v11, %v632_v23  ;;  %vm664_vm4 = vcmp.eq.f32.partialorder %v1501_v57, %v632_v23  ;;  %vm672_vm5 = vcmp.eq.f32.partialorder %v1519_v42, %v632_v23  ;;  %vm679_vm6 = vmand %vm545_vm0, %vm655_vm15  ;;  %v266_v57 = vld [vmem:[%s1272_s25 + $0x368] sm:$0xff] }
 0x16f   : > { %vm780_vm11 = vcmp.lt.s32.totalorder %v778_v61, %v779_v0  ;;  %v859_v27 = vmul.f32 %v632_v23, %v1458_v54  ;;  %vm680_vm7 = vmand %vm545_vm0, %vm656_vm14  ;;  %v715_v51 = vsel %vm664_vm4, %v1405_v4, 16  ;;  %v723_v12 = vsel %vm672_vm5, %v1407_v5, 16 }
 0x170   : > { %v781_v10 = vsel %vm780_vm11, %v778_v61, %v779_v0  ;;  %v706_v48 = vsel %vm679_vm6, %v1410_v6, 16  ;;  %v714_v11 = vsel %vm663_vm2, %v1405_v4, 16  ;;  %874 = vst [vmem:[#allocation1 + $0x24] sm:$0xff] %v858_v26  ;;  %v707_v29 = vsel %vm680_vm7, %v1410_v6, 16  ;;  %v268_v0 = vld [vmem:[%s1272_s25 + $0x378] sm:$0xff] }
 0x171   : > { %520 = vxpose.xlu1.b32.cont [12/16] (narrow) %v280_v47, 24  ;;  %vm844_vm12 = vcmp.lt.s32.totalorder %v781_v10, 15  ;;  %v798_v54 = vsel %vm579_vm1, %v723_v12, 2147483647  ;;  %875 = vst [vmem:[#allocation1 + $0x2d] sm:$0xff] %v859_v27  ;;  %v722_v30 = vsel %vm671_vm3, %v1407_v5, 16  ;;  %vm782_vm8 = vcmp.lt.s32.totalorder %v706_v48, %v714_v11 }
 0x172   : > { %488 = vxpose.xlu0.b32.cont [12/16] (narrow) %v264_v49, 24  ;;  %v845_v19 = vsel %vm844_vm12, %v781_v10, 15  ;;  %vm796_vm9 = vcmp.lt.s32.totalorder %v707_v29, %v715_v51  ;;  %v783_v31 = vsel %vm782_vm8, %v706_v48, %v714_v11  ;;  %v784_v32 = vsel %vm579_vm1, %v722_v30, 2147483647  ;;  %v267_v47 = vld [vmem:[%s1272_s25 + $0x370] sm:$0xff] }
 0x173   : > { %v885_v8 = vcvt.s32.f32 %v845_v19  ;;  %v797_v34 = vsel %vm796_vm9, %v707_v29, %v715_v51  ;;  %vm785_vm10 = vcmp.lt.s32.totalorder %v783_v31, %v784_v32  ;;  %vm905_vm12 = vcmask 1040384  }
 0x174   : > { %vm799_vm11 = vcmp.lt.s32.totalorder %v797_v34, %v798_v54  ;;  %v786_v37 = vsel %vm785_vm10, %v783_v31, %v784_v32  ;;  %v906_v41 = vsel %vm905_vm12, %v882_v33, %v898_v35  ;;  %vm909_vm15 = vcmask 1041408  }
 0x175   : > { %v900_v38 = vrot.slane %v885_v8, 5  ;;  %v800_v39 = vsel %vm799_vm11, %v797_v34, %v798_v54  ;;  %v787_v58 = vrot.slane %v786_v37, 4  ;;  %vm911_vm9 = vcmask 1044484  }
 0x176   : > { %v801_v42 = vrot.slane %v800_v39, 4 }
 0x177   : > { %v908_v43 = vsel %vm907_vm13, %v899_v36, %v900_v38  ;;  %vm788_vm2 = vcmp.lt.s32.totalorder %v786_v37, %v787_v58 }
 0x178   : > { %v1553_v44 = vsel %vm909_vm15, %v906_v41, %v908_v43  ;;  %vm802_vm3 = vcmp.lt.s32.totalorder %v800_v39, %v801_v42  ;;  %v789_v45 = vsel %vm788_vm2, %v786_v37, %v787_v58 }
 0x179   : > { %521 = vxpose.xlu1.b32.cont [13/16] (narrow) %v281_v17, 24  ;;  %v803_v49 = vsel %vm802_vm3, %v800_v39, %v801_v42  ;;  %v790_v50 = vrot.slane %v789_v45, 2 }
 0x17a   : > { %489 = vxpose.xlu0.b32.cont [13/16] (narrow) %v265_v15, 24  ;;  %v804_v52 = vrot.slane %v803_v49, 2 }
 0x17b   : > { %vm791_vm14 = vcmp.lt.s32.totalorder %v789_v45, %v790_v50 }
 0x17c   : > { %vm805_vm4 = vcmp.lt.s32.totalorder %v803_v49, %v804_v52  ;;  %v792_v53 = vsel %vm791_vm14, %v789_v45, %v790_v50 }
 0x17d   : > { %v806_v55 = vsel %vm805_vm4, %v803_v49, %v804_v52  ;;  %v793_v56 = vrot.slane %v792_v53, 1 }
 0x17e   : > { %v807_v59 = vrot.slane %v806_v55, 1 }
 0x17f   : > { %vm794_vm5 = vcmp.lt.s32.totalorder %v792_v53, %v793_v56 }
 0x180   : > { %vm808_vm6 = vcmp.lt.s32.totalorder %v806_v55, %v807_v59  ;;  %v795_v60 = vsel %vm794_vm5, %v792_v53, %v793_v56 }
 0x181   : > { %522 = vxpose.xlu1.b32.cont [14/16] (narrow) %v282_v28, 24  ;;  %v809_v61 = vsel %vm808_vm6, %v806_v55, %v807_v59  ;;  %vm846_vm7 = vcmp.lt.s32.totalorder %v795_v60, 15 }
 0x182   : > { %490 = vxpose.xlu0.b32.cont [14/16] (narrow) %v266_v57, 24  ;;  %vm848_vm8 = vcmp.lt.s32.totalorder %v809_v61, 15  ;;  %v847_v62 = vsel %vm846_vm7, %v795_v60, 15 }
 0x183   : > { %v849_v1 = vsel %vm848_vm8, %v809_v61, 15  ;;  %v886_v9 = vcvt.s32.f32 %v847_v62 }
 0x184   : > { %v887_v2 = vcvt.s32.f32 %v849_v1 }
 0x185   : > { %v901_v10 = vrot.slane %v886_v9, 4 }
 0x186   : > { %v902_v3 = vrot.slane %v887_v2, 3 }
 0x188   : > { %v1559_v13 = vsel %vm911_vm9, %v901_v10, %v902_v3 }
 0x189   : > { %523 = vxpose.xlu1.b32.cont [15/16] (narrow) %v283_v46, 24 }
 0x18a   : > { %491 = vxpose.xlu0.b32.cont [15/16] (narrow) %v267_v47, 24 }
 0x191   : > { %524 = vxpose.xlu1.b32.end [16/16] (narrow) %v284_v63, 24 }
 0x192   : > { %492 = vxpose.xlu0.b32.end [16/16] (narrow) %v268_v0, 24 }
 0x1bd   : > { %v525_v14 = vpop.trf.xlu1 }
 0x1be   : > { %v493_v17 = vpop.trf.xlu0  ;;  %v561_v18 = vsel %vm545_vm0, %v525_v14, -inf }
 0x1bf   : > { %v560_v19 = vsel %vm545_vm0, %v493_v17, -inf }
 0x1c5   : > { %v526_v15 = vpop.trf.xlu1 }
 0x1c6   : > { %v494_v7 = vpop.trf.xlu0  ;;  %v642_v20 = vmax.f32 %v561_v18, %v526_v15 }
 0x1c7   : > { %v633_v21 = vmax.f32 %v560_v19, %v494_v7 }
 0x1cd   : > { %v527_v22 = vpop.trf.xlu1 }
 0x1ce   : > { %v495_v16 = vpop.trf.xlu0  ;;  %v643_v23 = vsel %vm579_vm1, %v527_v22, -inf }
 0x1cf   : > { %v634_v24 = vsel %vm579_vm1, %v495_v16, -inf  ;;  %v644_v25 = vmax.f32 %v642_v20, %v643_v23 }
 0x1d0   : > { %v635_v8 = vmax.f32 %v633_v21, %v634_v24 }
 0x1d1   : > { %v645_v26 = vrot.slane %v644_v25, 4 }
 0x1d2   : > { %v636_v27 = vrot.slane %v635_v8, 4 }
 0x1d3   : > { %v646_v28 = vmax.f32 %v644_v25, %v645_v26 }
 0x1d4   : > { %v637_v51 = vmax.f32 %v635_v8, %v636_v27 }
 0x1d5   : > { %v647_v12 = vrot.slane %v646_v28, 2 }
 0x1d6   : > { %v638_v48 = vrot.slane %v637_v51, 2 }
 0x1d7   : > { %v648_v11 = vmax.f32 %v646_v28, %v647_v12 }
 0x1d8   : > { %v639_v57 = vmax.f32 %v637_v51, %v638_v48 }
 0x1d9   : > { %v649_v29 = vrot.slane %v648_v11, 1 }
 0x1da   : > { %v640_v54 = vrot.slane %v639_v57, 1 }
 0x1db   : > { %v650_v30 = vmax.f32 %v648_v11, %v649_v29 }
 0x1dc   : > { %v641_v31 = vmax.f32 %v639_v57, %v640_v54 }
 0x1dd   : > { %vm658_vm10 = vcmp.eq.f32.partialorder %v561_v18, %v650_v30  ;;  %vm666_vm11 = vcmp.eq.f32.partialorder %v526_v15, %v650_v30  ;;  %vm674_vm12 = vcmp.eq.f32.partialorder %v527_v22, %v650_v30  ;;  %v861_v32 = vmul.f32 %v650_v30, %v525_v14 }
 0x1de   : > { %vm682_vm13 = vmand %vm545_vm0, %vm658_vm10  ;;  %v717_v33 = vsel %vm666_vm11, %v1405_v4, 16  ;;  %v725_v34 = vsel %vm674_vm12, %v1407_v5, 16  ;;  %vm657_vm15 = vcmp.eq.f32.partialorder %v560_v19, %v641_v31  ;;  %vm665_vm2 = vcmp.eq.f32.partialorder %v494_v7, %v641_v31 }
 0x1df   : > { %v709_v35 = vsel %vm682_vm13, %v1410_v6, 16  ;;  %877 = vst [vmem:[#allocation1 + $0x3f] sm:$0xff] %v861_v32  ;;  %vm673_vm3 = vcmp.eq.f32.partialorder %v495_v16, %v641_v31  ;;  %vm681_vm14 = vmand %vm545_vm0, %vm657_vm15  ;;  %v716_v36 = vsel %vm665_vm2, %v1405_v4, 16  ;;  %v860_v39 = vmul.f32 %v641_v31, %v493_v17 }
 0x1e0   : > { %vm824_vm4 = vcmp.lt.s32.totalorder %v709_v35, %v717_v33  ;;  %v708_v37 = vsel %vm681_vm14, %v1410_v6, 16  ;;  %v724_v38 = vsel %vm673_vm3, %v1407_v5, 16  ;;  %v826_v41 = vsel %vm579_vm1, %v725_v34, 2147483647 }
 0x1e1   : > { %v825_v58 = vsel %vm824_vm4, %v709_v35, %v717_v33  ;;  %vm810_vm5 = vcmp.lt.s32.totalorder %v708_v37, %v716_v36  ;;  %v812_v40 = vsel %vm579_vm1, %v724_v38, 2147483647  ;;  %876 = vst [vmem:[#allocation1 + $0x36] sm:$0xff] %v860_v39 }
 0x1e2   : > { %vm827_vm6 = vcmp.lt.s32.totalorder %v825_v58, %v826_v41  ;;  %v811_v42 = vsel %vm810_vm5, %v708_v37, %v716_v36 }
 0x1e3   : > { %v828_v4 = vsel %vm827_vm6, %v825_v58, %v826_v41  ;;  %vm813_vm0 = vcmp.lt.s32.totalorder %v811_v42, %v812_v40 }
 0x1e4   : > { %v829_v5 = vrot.slane %v828_v4, 4  ;;  %v814_v6 = vsel %vm813_vm0, %v811_v42, %v812_v40 }
 0x1e5   : > { %v815_v43 = vrot.slane %v814_v6, 4 }
 0x1e6   : > { %vm830_vm7 = vcmp.lt.s32.totalorder %v828_v4, %v829_v5 }
 0x1e7   : > { %v831_v45 = vsel %vm830_vm7, %v828_v4, %v829_v5  ;;  %vm816_vm8 = vcmp.lt.s32.totalorder %v814_v6, %v815_v43 }
 0x1e8   : > { %v832_v46 = vrot.slane %v831_v45, 2  ;;  %v817_v47 = vsel %vm816_vm8, %v814_v6, %v815_v43  ;;  %v879_v50 = vld [vmem:[#allocation1 + $0x4] ss:$9 sm:$0xff] }
 0x1e9   : > { %v818_v49 = vrot.slane %v817_v47, 2  ;;  %881 = vst [vmem:[%s141_s4] sm:$0xff] %v879_v50 }
 0x1ea   : > { %vm833_vm1 = vcmp.lt.s32.totalorder %v831_v45, %v832_v46 }
 0x1eb   : > { %v834_v52 = vsel %vm833_vm1, %v831_v45, %v832_v46  ;;  %vm1591_vm9 = vcmp.lt.s32.totalorder %v817_v47, %v818_v49 }
 0x1ec   : > { %1136 = shalt.err (!%p1133_p3)
}
 0x1ed   : > { %1065 = dma.vmem_to_hbm [thread:$0]  (%p1258_p5), %s940_s5, 128, %s942_s6, %s922_s7   ;;  %v835_v55 = vrot.slane %v834_v52, 1  ;;  %v820_v56 = vsel %vm1591_vm9, %v817_v47, %v818_v49  ;;  %vm913_vm15 = vcmask 1046534   ;;  %vm915_vm2 = vcmask 1045508  }
 0x1ee   : > { %v821_v59 = vrot.slane %v820_v56, 1  ;;  %s951_s29 = scalar_lea.hbm %s1647_s2, %s1061_s27  ;;  %s148_s30 = scalar_lea.vmem [#allocation4], %s1052_s28  ;;  %vm917_vm3 = vcmask 1043456  }
 0x1ef   : > { %vm836_vm10 = vcmp.lt.s32.totalorder %v834_v52, %v835_v55  ;;  %s953_s3 = sshll.u32 %s148_s30, 4  ;;  %s955_s4 = sshll.u32 %s951_s29, 4  ;;  %s954_s3 = int_to_ptr.vmem [resolvable:$true] %s953_s3  ;;  %s956_s4 = int_to_ptr.hbm [resolvable:$true] %s955_s4 }
 0x1f0   : > { %v837_v60 = vsel %vm836_vm10, %v834_v52, %v835_v55  ;;  %vm822_vm11 = vcmp.lt.s32.totalorder %v820_v56, %v821_v59  ;;  %s927_s13 = scalar_lea.sflag [#allocation5], %s1572_s26  ;;  %s1151_s27 = sshra.s32 %s956_s4, 4  ;;  %s1152_s27 = int_to_ptr.hbm [resolvable:$true] %s1151_s27 }
 0x1f1   : > { %vm852_vm12 = vcmp.lt.s32.totalorder %v837_v60, 15  ;;  %v823_v61 = vsel %vm822_vm11, %v820_v56, %v821_v59  ;;  %s1153_s5 = scalar_lea.hbm %s1152_s27, 8  ;;  %s1157_s7 = scalar_lea.hbm %s1647_s2, 16 }
 0x1f2   : > { %v853_v63 = vsel %vm852_vm12, %v837_v60, 15  ;;  %vm850_vm13 = vcmp.lt.s32.totalorder %v823_v61, 15  ;;  %p1154_p4 = scmp.ne.s32.totalorder %s1152_s27, %s1153_s5  ;;  %p1158_p9 = scmp.lt.s32.totalorder %s1152_s27, %s1647_s2 }
 0x1f3   : > { %v889_v0 = vcvt.s32.f32 %v853_v63  ;;  %v851_v1 = vsel %vm850_vm13, %v823_v61, 15  ;;  %p1159_p10 = scmp.lt.s32.totalorder %s1157_s7, %s1153_s5 }
 0x1f4   : > { %v888_v62 = vcvt.s32.f32 %v851_v1  ;;  %p1155_p7 = pnand %p1154_p4, %p1258_p5 }
 0x1f5   : > { %v904_v2 = vrot.slane %v889_v0, 1  ;;  %p1160_p11 = por %p1159_p10, %p1158_p9 }
 0x1f6   : > { %v903_v3 = vrot.slane %v888_v62, 2  ;;  %p1156_p8 = pneg %p1155_p7 }
 0x1f8   : > { %v914_v9 = vsel %vm913_vm15, %v903_v3, %v904_v2  ;;  %p1161_p12 = pnand %p1160_p11, %p1156_p8 }
 0x1f9   : > { %v916_v10 = vsel %vm915_vm2, %v1559_v13, %v914_v9 }
 0x1fa   : > { %v918_v14 = vsel %vm917_vm3, %v1553_v44, %v916_v10 }
 0x1fb   : > { %920 = vst [vmem:[%s148_s30] sm:$0xff] %v918_v14 }
 0x1fc   : > { %1164 = shalt.err (!%p1161_p12)
}
 0x1fd   : > { %1066 = dma.vmem_to_hbm [thread:$0]  (%p1258_p5), %s954_s3, 128, %s956_s4, %s927_s13  }
 0x1fe PF: > { %p1076_p13 = scmp.ge.s32.totalorder %s1203_s12, 2  ;;  %s967_s26 = sand.u32 1, %s1191_s9  }
 0x1ff   : > { %s968_s16 = scalar_lea.sflag [#allocation3], %s967_s26 }
 0x200   : > { %p1070_p0 = pnand %p1076_p13, %p1262_p6 }
 0x202   : > { %p1071_p1 = pneg %p1070_p0 }
 0x204   : > { %1182 = dma.done.wait (%p1071_p1), %s968_s16, 128  }
 0x205   : > { %1184 = vsyncadd (%p1071_p1), %s968_s16, 4294967168  ;;  %s978_s17 = scalar_lea.sflag [#allocation5], %s967_s26 }
 0x206   : > { %1186 = dma.done.wait (%p1071_p1), %s978_s17, 128  }
 0x207   : > { %1188 = vsyncadd (%p1071_p1), %s978_s17, 4294967168  ;;  %p16_p5 = scmp.ge.s32.totalorder %s1245_s15, 4   ;;  %s1654_s9 = smov %s1195_s10 }
 0x208   : > { %s1655_s10 = smov %s1199_s11  ;;  %s1656_s11 = smov %s1256_s18 }
 0x209   : > { %s1657_s12 = smov %s1245_s15  ;;  %18 = sbr.rel (!%p16_p5) target bundleno = 5 (0x5), region = 77 }
 0x20e   :  { %984 = vsyncpa [#allocation3], 1 }
 0x20f   :  { %986 = vsyncpa [#allocation3 + $0x1], 1 }
 0x210   :  { %987 = vsyncpa [#allocation5], 1 }
 0x211   :  { %989 = vsyncpa [#allocation5 + $0x1], 1 }

</bundles_post_ra>
